<compile_context>
chip_gen: v5e
topology: v5e:2x2
jax: 0.10.0
libtpu: 0.0.40
codegen_flags: <defaults>
</compile_context>

<pallas_src>
import functools

import jax
import jax.numpy as jnp
from jax.experimental import pallas as pl
from jax.experimental.pallas import tpu as pltpu


def encoder_block_kernel(
    x_ref,      # (nb, Cin, T)    storage dtype (f32 or bf16)
    wblk_ref,   # (Cout, Cin)     storage dtype
    bblk_ref,   # (Cout, 1)       f32
    ws1p_ref,   # (R, Cin)        storage dtype (ws1 @ wblk, folded)
    bs1p_ref,   # (R, 1)          f32          (ws1 @ bblk + bs1, folded)
    ws2_ref,    # (1, R)          storage dtype
    bs2_ref,    # (1,)            f32, SMEM
    g2_ref,     # (nb, Cout, 1)   f32, precomputed channel gate
    o_ref,      # (nb, Cout, T)
):
    cdt = x_ref.dtype           # MXU input dtype (f32 or bf16)
    nb = x_ref.shape[0]         # static batch-block

    # Hoist weight/bias loads out of the (small, unrolled) batch loop.
    wblk = wblk_ref[...]
    bblk = bblk_ref[...]
    ws1p = ws1p_ref[...]
    bs1p = bs1p_ref[...]
    ws2 = ws2_ref[...]
    bs2 = bs2_ref[0]

    for b in range(nb):
        xv = x_ref[b]                                               # (Cin, T)

        # --- self.block(x): 1x1 conv == (Cout,Cin)@(Cin,T), f32 accumulation
        xb = jnp.dot(wblk, xv, preferred_element_type=jnp.float32) + bblk

        # --- SpatialAttentionGate with block conv folded into fc1:
        #     conv1x1 -> relu -> conv1x1 -> sigmoid, all reading x directly.
        s1 = jnp.dot(ws1p, xv, preferred_element_type=jnp.float32) + bs1p
        s1 = jnp.maximum(s1, 0.0)
        g1 = jax.nn.sigmoid(
            jnp.dot(ws2, s1.astype(cdt),
                    preferred_element_type=jnp.float32) + bs2)     # (1, T) f32

        # --- fused gating epilogue: xb*g1 + xb*g2 == xb*(g1+g2), f32 math.
        o_ref[b] = (xb * (g1 + g2_ref[b])).astype(o_ref.dtype)


def _choose_tiling(B, Cin, Cout, R, HWp, in_bytes, out_bytes):
    """Pick (nb, tile_hw): batch rows & HW columns per grid step.

    Goals:
      * per-step HBM traffic ~2 MiB to amortize the ~0.35us fixed step
        overhead even at v7x's ~3.2 TB/s;
      * conservatively-estimated VMEM working set <= ~12 MiB (we also raise
        vmem_limit_bytes to 32 MiB, valid on v5e/v6e/v7x);
      * keep >= 2 grid steps when possible so v7x's two TensorCores get work.
    """
    LANE = 128
    n_blk = HWp // LANE
    bytes_per_col = Cin * in_bytes + Cout * out_bytes            # HBM in+out / column
    # double-buffered io tiles + f32 intermediates (xb, s1, g1) per column
    vmem_per_col = 2 * bytes_per_col + (Cout + R + 1) * 4
    VMEM_BUDGET = 12 << 20
    TARGET_STEP_BYTES = 2 << 20

    # Largest lane-multiple tile_hw dividing HWp that fits the VMEM budget.
    max_cols = max(LANE, VMEM_BUDGET // vmem_per_col)
    tile_hw = LANE
    for d in range(n_blk, 0, -1):
        if n_blk % d == 0 and d * LANE <= max_cols:
            tile_hw = d * LANE
            break
    n_tiles = HWp // tile_hw

    # Grow batch-block nb (divisor of B, modest unroll) only while per-step
    # traffic is still below target, VMEM fits, and >= 2 grid steps remain.
    nb = 1
    for cand in range(2, min(B, 8) + 1):
        if B % cand:
            continue
        if nb * tile_hw * bytes_per_col >= TARGET_STEP_BYTES:
            break
        if cand * tile_hw * vmem_per_col > VMEM_BUDGET:
            break
        if (B // cand) * n_tiles < 2 and B * n_tiles >= 2:
            break
        nb = cand
    return nb, tile_hw


def encoder_block(x_nchw, params, *, dtype=jnp.bfloat16):
    """x_nchw: (B, Cin, H, W). Returns (B, Cout, H, W) in `dtype`."""
    B, Cin, H, W = x_nchw.shape
    HW = H * W
    Cout = params["wblk"].shape[0]
    R = params["ws1"].shape[0]

    # NCHW -> (B, Cin, HW): free reshape, no transpose.
    x = x_nchw.reshape(B, Cin, HW)

    # Storage / MXU-input dtype cast at the boundary (bf16 by default).
    x_c = x.astype(dtype)

    # ---- ChannelAttentionGate hoisted to the wrapper via linearity of mean:
    #      mean_HW(block(x)) = wblk @ mean_HW(x) + bblk   (f32 accumulation)
    wblk32 = params["wblk"].astype(jnp.float32)
    bblk32 = params["bblk"].astype(jnp.float32)
    x_mean = jnp.mean(x_c, axis=2, dtype=jnp.float32)              # (B, Cin)
    y = x_mean @ wblk32.T + bblk32[:, 0]                           # (B, Cout)
    h = jnp.maximum(y @ params["wc1"] + params["bc1"], 0.0)        # (B, Cr)
    g2 = jax.nn.sigmoid(h @ params["wc2"] + params["bc2"])         # (B, Cout)
    g2 = g2[:, :, None].astype(jnp.float32)                        # (B, Cout, 1)

    # ---- Fold block conv into spatial fc1 (exact in f32):
    #      s1 = ws1 @ (wblk @ x + bblk) + bs1 = ws1p @ x + bs1p
    ws1_32 = params["ws1"].astype(jnp.float32)
    ws1p32 = ws1_32 @ wblk32                                       # (R, Cin)
    bs1p32 = ws1_32 @ bblk32 + params["bs1"].astype(jnp.float32)   # (R, 1)

    # ---- Pad HW up to a lane multiple so output stores stay lane-dense.
    HWp = ((HW + 127) // 128) * 128
    if HWp != HW:
        x_c = jnp.pad(x_c, ((0, 0), (0, 0), (0, HWp - HW)))

    itemsize = jnp.dtype(dtype).itemsize
    nb, tile_hw = _choose_tiling(B, Cin, Cout, R, HWp, itemsize, itemsize)
    n_tiles = HWp // tile_hw

    wblk = params["wblk"].astype(dtype)
    ws1p = ws1p32.astype(dtype)
    ws2 = params["ws2"].astype(dtype)
    bs2 = params["bs2"].astype(jnp.float32)

    def wspec(shape):
        return pl.BlockSpec(shape, lambda bi, ti: (0,) * len(shape))

    out = pl.pallas_call(
        encoder_block_kernel,
        out_shape=jax.ShapeDtypeStruct((B, Cout, HWp), dtype),
        grid_spec=pltpu.PrefetchScalarGridSpec(
            num_scalar_prefetch=0,
            grid=(B // nb, n_tiles),
            in_specs=[
                pl.BlockSpec((nb, Cin, tile_hw), lambda bi, ti: (bi, 0, ti)),
                wspec((Cout, Cin)),
                wspec((Cout, 1)),
                wspec((R, Cin)),
                wspec((R, 1)),
                wspec((1, R)),
                pl.BlockSpec(memory_space=pltpu.MemorySpace.SMEM),       # bs2
                pl.BlockSpec((nb, Cout, 1), lambda bi, ti: (bi, 0, 0)),  # g2
            ],
            out_specs=pl.BlockSpec((nb, Cout, tile_hw),
                                   lambda bi, ti: (bi, 0, ti)),
        ),
        compiler_params=pltpu.CompilerParams(
            dimension_semantics=("parallel", "parallel"),
            vmem_limit_bytes=32 * 1024 * 1024),
    )(x_c, wblk, bblk32, ws1p, bs1p32, ws2, bs2, g2)

    if HWp != HW:
        out = out[:, :, :HW]
    # (B, Cout, HW) -> (B, Cout, H, W): free reshape.
    return out.reshape(B, Cout, H, W)


def reference(x_nchw, params):
    """Pure-JAX reference of the PyTorch forward (NCHW semantics)."""
    B, Cin, H, W = x_nchw.shape
    x = x_nchw.reshape(B, Cin, H * W)
    xb = jnp.einsum("oc,bcn->bon", params["wblk"], x) + params["bblk"][None]
    s1 = jnp.maximum(
        jnp.einsum("rc,bcn->brn", params["ws1"], xb) + params["bs1"][None], 0.0)
    g1 = jax.nn.sigmoid(
        jnp.einsum("or,brn->bon", params["ws2"], s1) + params["bs2"][0])
    y = jnp.mean(xb, axis=2)                                   # (B, Cout)
    h = jnp.maximum(y @ params["wc1"] + params["bc1"], 0.0)
    g2 = jax.nn.sigmoid(h @ params["wc2"] + params["bc2"])[:, :, None]
    out = xb * g1 + xb * g2
    return out.reshape(B, params["wblk"].shape[0], H, W)


def init_params(key, cin, cout, spatial_reduction=16, channel_reduction=16):
    ks = jax.random.split(key, 10)
    cr = cout // channel_reduction
    s = 0.1
    n = lambda k, shape: s * jax.random.normal(k, shape, jnp.float32)
    return {
        # block: 1x1 conv, weight stored (Cout, Cin)
        "wblk": n(ks[0], (cout, cin)),
        "bblk": n(ks[1], (cout, 1)),
        # SpatialAttentionGate: Conv2d(Cout, 16, 1) ; Conv2d(16, 1, 1)
        "ws1": n(ks[2], (spatial_reduction, cout)),
        "bs1": n(ks[3], (spatial_reduction, 1)),
        "ws2": n(ks[4], (1, spatial_reduction)),
        "bs2": n(ks[5], (1,)),
        # ChannelAttentionGate: Linear(Cout, Cout//16) ; Linear(Cout//16, Cout)
        "wc1": n(ks[6], (cout, cr)),
        "bc1": n(ks[7], (cr,)),
        "wc2": n(ks[8], (cr, cout)),
        "bc2": n(ks[9], (cout,)),
    }


if __name__ == "__main__":
    key = jax.random.PRNGKey(0)
    k_x, k_p = jax.random.split(key)

    B, Cin, H, W = 2, 4, 16, 16
    Cout = 32  # must be >= 16 so channel reduction (//16) is valid

    x = jax.random.normal(k_x, (B, Cin, H, W), jnp.float32)
    params = init_params(k_p, Cin, Cout)
    ref = reference(x, params)

    fwd_f32 = jax.jit(functools.partial(encoder_block, dtype=jnp.float32))
    fwd_bf16 = jax.jit(functools.partial(encoder_block, dtype=jnp.bfloat16))

    # f32 path (near-exact vs reference; only reassociation differences from
    # the mean hoist and the ws1@wblk fold).
    out = jax.block_until_ready(fwd_f32(x, params))
    assert out.shape == (B, Cout, H, W)
    assert jnp.allclose(out, ref, atol=1e-4, rtol=1e-4), "f32 mismatch vs reference"

    # bf16 storage path (default): bf16 x / weights / output, f32 accumulation
    # and gate math.
    out_bf16 = jax.block_until_ready(fwd_bf16(x, params))
    assert out_bf16.shape == (B, Cout, H, W)
    assert jnp.allclose(out_bf16.astype(jnp.float32), ref, atol=5e-2, rtol=5e-2), \
        "bf16 mismatch vs reference"

    print("KERNEL_OK")
</pallas_src>

<mosaic_0001>
module attributes {stable_mosaic.version = 11 : i64} {
  func.func @encoder_block_kernel(%arg0: i32, %arg1: i32, %arg2: memref<1x4x256xf32, #tpu.memory_space<vmem>>, %arg3: memref<32x4xf32, #tpu.memory_space<vmem>>, %arg4: memref<32x1xf32, #tpu.memory_space<vmem>>, %arg5: memref<16x4xf32, #tpu.memory_space<vmem>>, %arg6: memref<16x1xf32, #tpu.memory_space<vmem>>, %arg7: memref<1x16xf32, #tpu.memory_space<vmem>>, %arg8: memref<1xf32, #tpu.memory_space<smem>>, %arg9: memref<1x32x1xf32, #tpu.memory_space<vmem>>, %arg10: memref<1x32x256xf32, #tpu.memory_space<vmem>>) attributes {dimension_semantics = [#tpu.dimension_semantics<parallel>, #tpu.dimension_semantics<parallel>], iteration_bounds = array<i64: 2, 1>, scalar_prefetch = 0 : i64, scratch_operands = 0 : i64, tpu.core_type = #tpu.core_type<tc>, window_params = [{transform_indices = @transform_0, window_bounds = array<i64: 1, 4, 256>}, {pipeline_mode = #tpu.pipeline_mode<synchronous>, transform_indices = @transform_1, window_bounds = array<i64: 32, 4>}, {pipeline_mode = #tpu.pipeline_mode<synchronous>, transform_indices = @transform_2, window_bounds = array<i64: 32, 1>}, {pipeline_mode = #tpu.pipeline_mode<synchronous>, transform_indices = @transform_3, window_bounds = array<i64: 16, 4>}, {pipeline_mode = #tpu.pipeline_mode<synchronous>, transform_indices = @transform_4, window_bounds = array<i64: 16, 1>}, {pipeline_mode = #tpu.pipeline_mode<synchronous>, transform_indices = @transform_5, window_bounds = array<i64: 1, 16>}, {transform_indices = @transform_6, window_bounds = array<i64: 1>}, {transform_indices = @transform_7, window_bounds = array<i64: 1, 32, 1>}, {transform_indices = @transform_8, window_bounds = array<i64: 1, 32, 256>}]} {
    %c0 = arith.constant 0 : index
    %c0_0 = arith.constant 0 : index
    %0 = vector.load %arg3[%c0, %c0_0] : memref<32x4xf32, #tpu.memory_space<vmem>>, vector<32x4xf32>
    %c0_1 = arith.constant 0 : index
    %c0_2 = arith.constant 0 : index
    %1 = vector.load %arg4[%c0_1, %c0_2] : memref<32x1xf32, #tpu.memory_space<vmem>>, vector<32x1xf32>
    %c0_3 = arith.constant 0 : index
    %c0_4 = arith.constant 0 : index
    %2 = vector.load %arg5[%c0_3, %c0_4] : memref<16x4xf32, #tpu.memory_space<vmem>>, vector<16x4xf32>
    %c0_5 = arith.constant 0 : index
    %c0_6 = arith.constant 0 : index
    %3 = vector.load %arg6[%c0_5, %c0_6] : memref<16x1xf32, #tpu.memory_space<vmem>>, vector<16x1xf32>
    %c0_7 = arith.constant 0 : index
    %c0_8 = arith.constant 0 : index
    %4 = vector.load %arg7[%c0_7, %c0_8] : memref<1x16xf32, #tpu.memory_space<vmem>>, vector<1x16xf32>
    %c0_9 = arith.constant 0 : index
    %5 = memref.load %arg8[%c0_9] : memref<1xf32, #tpu.memory_space<smem>>
    %c0_10 = arith.constant 0 : index
    %c0_11 = arith.constant 0 : index
    %c0_12 = arith.constant 0 : index
    %6 = vector.load %arg2[%c0_10, %c0_11, %c0_12] : memref<1x4x256xf32, #tpu.memory_space<vmem>>, vector<1x4x256xf32>
    %7 = vector.shape_cast %6 : vector<1x4x256xf32> to vector<4x256xf32>
    %cst = arith.constant dense<0.000000e+00> : vector<32x256xf32>
    %8 = tpu.matmul %0, %7, %cst {dimension_numbers = #tpu.dot_dimension_numbers<[1], [0], [0], [1], [0, 0, 1, 1], [], []>} : vector<32x4xf32>, vector<4x256xf32>, vector<32x256xf32> -> vector<32x256xf32>
    %9 = vector.broadcast %1 : vector<32x1xf32> to vector<32x256xf32>
    %10 = arith.addf %8, %9 : vector<32x256xf32>
    %cst_13 = arith.constant dense<0.000000e+00> : vector<16x256xf32>
    %11 = tpu.matmul %2, %7, %cst_13 {dimension_numbers = #tpu.dot_dimension_numbers<[1], [0], [0], [1], [0, 0, 1, 1], [], []>} : vector<16x4xf32>, vector<4x256xf32>, vector<16x256xf32> -> vector<16x256xf32>
    %12 = vector.broadcast %3 : vector<16x1xf32> to vector<16x256xf32>
    %13 = arith.addf %11, %12 : vector<16x256xf32>
    %cst_14 = arith.constant 0.000000e+00 : f32
    %14 = vector.broadcast %cst_14 : f32 to vector<16x256xf32>
    %15 = arith.maximumf %13, %14 : vector<16x256xf32>
    %cst_15 = arith.constant dense<0.000000e+00> : vector<1x256xf32>
    %16 = tpu.matmul %4, %15, %cst_15 {dimension_numbers = #tpu.dot_dimension_numbers<[1], [0], [0], [1], [0, 0, 1, 1], [], []>} : vector<1x16xf32>, vector<16x256xf32>, vector<1x256xf32> -> vector<1x256xf32>
    %17 = vector.broadcast %5 : f32 to vector<1x256xf32>
    %18 = arith.addf %16, %17 : vector<1x256xf32>
    %19 = arith.negf %18 : vector<1x256xf32>
    %20 = math.exp %19 : vector<1x256xf32>
    %cst_16 = arith.constant 1.000000e+00 : f32
    %21 = vector.broadcast %cst_16 : f32 to vector<1x256xf32>
    %22 = arith.addf %21, %20 : vector<1x256xf32>
    %23 = arith.divf %21, %22 : vector<1x256xf32>
    %c0_17 = arith.constant 0 : index
    %c0_18 = arith.constant 0 : index
    %c0_19 = arith.constant 0 : index
    %24 = vector.load %arg9[%c0_17, %c0_18, %c0_19] : memref<1x32x1xf32, #tpu.memory_space<vmem>>, vector<1x32x1xf32>
    %25 = vector.shape_cast %24 : vector<1x32x1xf32> to vector<32x1xf32>
    %26 = vector.broadcast %23 : vector<1x256xf32> to vector<32x256xf32>
    %27 = vector.broadcast %25 : vector<32x1xf32> to vector<32x256xf32>
    %28 = arith.addf %26, %27 : vector<32x256xf32>
    %29 = arith.mulf %10, %28 : vector<32x256xf32>
    %c0_20 = arith.constant 0 : index
    %c0_21 = arith.constant 0 : index
    %c0_22 = arith.constant 0 : index
    %30 = vector.load %arg10[%c0_20, %c0_21, %c0_22] : memref<1x32x256xf32, #tpu.memory_space<vmem>>, vector<1x32x256xf32>
    %31 = vector.shape_cast %30 : vector<1x32x256xf32> to vector<32x256xf32>
    %32 = vector.shape_cast %29 : vector<32x256xf32> to vector<1x32x256xf32>
    tpu.vector_store %arg10[%c0_20, %c0_21, %c0_22], %32 {strides = array<i32>} : memref<1x32x256xf32, #tpu.memory_space<vmem>>, vector<1x32x256xf32>,
    return
  }
  func.func @transform_0(%arg0: i32, %arg1: i32) -> (i32, i32, i32) {
    %c0_i32 = arith.constant 0 : i32
    %c0_i32_0 = arith.constant 0 : i32
    return %arg0, %c0_i32, %arg1 : i32, i32, i32
  }
  func.func @transform_1(%arg0: i32, %arg1: i32) -> (i32, i32) {
    %c0_i32 = arith.constant 0 : i32
    %c0_i32_0 = arith.constant 0 : i32
    %c0_i32_1 = arith.constant 0 : i32
    return %c0_i32, %c0_i32_0 : i32, i32
  }
  func.func @transform_2(%arg0: i32, %arg1: i32) -> (i32, i32) {
    %c0_i32 = arith.constant 0 : i32
    %c0_i32_0 = arith.constant 0 : i32
    %c0_i32_1 = arith.constant 0 : i32
    return %c0_i32, %c0_i32_0 : i32, i32
  }
  func.func @transform_3(%arg0: i32, %arg1: i32) -> (i32, i32) {
    %c0_i32 = arith.constant 0 : i32
    %c0_i32_0 = arith.constant 0 : i32
    %c0_i32_1 = arith.constant 0 : i32
    return %c0_i32, %c0_i32_0 : i32, i32
  }
  func.func @transform_4(%arg0: i32, %arg1: i32) -> (i32, i32) {
    %c0_i32 = arith.constant 0 : i32
    %c0_i32_0 = arith.constant 0 : i32
    %c0_i32_1 = arith.constant 0 : i32
    return %c0_i32, %c0_i32_0 : i32, i32
  }
  func.func @transform_5(%arg0: i32, %arg1: i32) -> (i32, i32) {
    %c0_i32 = arith.constant 0 : i32
    %c0_i32_0 = arith.constant 0 : i32
    %c0_i32_1 = arith.constant 0 : i32
    return %c0_i32, %c0_i32_0 : i32, i32
  }
  func.func @transform_6(%arg0: i32, %arg1: i32) -> i32 {
    %c0_i32 = arith.constant 0 : i32
    %c0_i32_0 = arith.constant 0 : i32
    return %c0_i32 : i32
  }
  func.func @transform_7(%arg0: i32, %arg1: i32) -> (i32, i32, i32) {
    %c0_i32 = arith.constant 0 : i32
    %c0_i32_0 = arith.constant 0 : i32
    %c0_i32_1 = arith.constant 0 : i32
    return %arg0, %c0_i32, %c0_i32_0 : i32, i32, i32
  }
  func.func @transform_8(%arg0: i32, %arg1: i32) -> (i32, i32, i32) {
    %c0_i32 = arith.constant 0 : i32
    %c0_i32_0 = arith.constant 0 : i32
    return %arg0, %c0_i32, %arg1 : i32, i32, i32
  }
}

</mosaic_0001>

<bundles_post_ra>
// kernel: encoder_block.1
= control target key start
LH: loop header
LB: loop body
LE: loop exit
PB: predicated region body
PF: predicated region fallthrough
CT: control target
= control target key end

     0   :  { %s931_s29 = smov 0   ;;  %s933_s30 = smov 0   ;;  %s1029_s0 = inlined_call_operand.vmem [shape: f32[2,4,256], index: 0, kind: input, shape index: {}]   ;;  %s1030_s1 = inlined_call_operand.vmem [shape: f32[32,4], index: 1, kind: input, shape index: {}]   ;;  %s1031_s2 = inlined_call_operand.vmem [shape: f32[32,1], index: 2, kind: input, shape index: {}]   ;;  %s1032_s3 = inlined_call_operand.vmem [shape: f32[16,4], index: 3, kind: input, shape index: {}]   ;;  %s1033_s4 = inlined_call_operand.vmem [shape: f32[16,1], index: 4, kind: input, shape index: {}]   ;;  %s1034_s5 = inlined_call_operand.vmem [shape: f32[1,16], index: 5, kind: input, shape index: {}]   ;;  %s1035_s6 = inlined_call_operand.<no memory space> [shape: f32[1], index: 6, kind: input, shape index: {}]   ;;  %s1036_s7 = inlined_call_operand.vmem [shape: f32[2,32,1], index: 7, kind: input, shape index: {}]   ;;  %s1037_s8 = inlined_call_operand.vmem [shape: f32[2,32,256], index: 8, kind: output, shape index: {}]  }
   0x1   :  { %13 = sst [smem:[#allocation2]] %s1035_s6  ;;  %s935_s9 = smov 0  }
   0x2 LB: > { %s31_s6 = sadd.s32 1, %s876_s30  ;;  %p790_p0 = scmp.ge.s32.totalorder %s880_s9, 1  ;;  %s880_s9 = sphi %s935_s9, %s19_s9   ;;  %s876_s30 = sphi %s933_s30, %s1039_s30   ;;  %s872_s29 = sphi %s931_s29, %s1038_s29  }
   0x3   : > { %p33_p1 = scmp.ge.s32.totalorder %s31_s6, 2  ;;  %p294_p2 = scmp.lt.s32.totalorder %s880_s9, 3 }
   0x5   : > { %s1041_s6 = smov (%p33_p1, %s31_s6), 0  ;;  %p295_p3 = pnand %p790_p0, %p294_p2 }
   0x6   : > { %p342_p4 = scmp.lt.s32.totalorder (!%p295_p3), %s872_s29, 1  ;;  %s379_s25 = sld [smem:[#allocation2]] (!%p295_p3) }
   0x7   : > { %298 = sbr.rel (%p295_p3) target bundleno = 356 (0x164), region = 52 }
   0xc   : > { %v377_v0 = vld [vmem:[%s1033_s4 + $0x8] sm:$0xff]  ;;  %v882_v1 = vmov 0   ;;  %s1043_s29 = smov (!%p342_p4, %s872_s29), 1  ;;  %v376_v3 = vld [vmem:[%s1033_s4] sm:$0xff]  ;;  %vm418_vm0 = vcmask 1043456   ;;  %vm405_vm1 = vcmask 31744   ;;  %v554_v37 = vstv %s379_s25 }
   0xd   : > { %847 = vset.pattern.permute.xlu0 %v882_v1  ;;  %848 = vset.pattern.permute.xlu1 %v882_v1  ;;  %s819_s12 = sshll.u32 %s1043_s29, 3  ;;  %s820_s18 = sshll.u32 %s1043_s29, 5  ;;  %v374_v7 = vld [vmem:[%s1032_s3] sm:$0xff]  ;;  %v375_v11 = vld [vmem:[%s1032_s3 + $0x8] sm:$0xff]  ;;  %v372_v14 = vld [vmem:[%s1031_s2 + $0x10] sm:$0xff]  ;;  %vm555_vm2 = vcmask 130048  }
   0xe   : > { %488 = vperm.xlu0 %847, %v377_v0   ;;  %849 = vset.pattern.permute.xlu2 %v882_v1  ;;  %s349_s15 = scalar_lea.vmem %s1029_s0, %s819_s12  ;;  %s965_s21 = scalar_lea.vmem %s1036_s7, %s820_s18  ;;  %v366_v12 = vld [vmem:[%s1030_s1] sm:$0xff]  ;;  %v367_v15 = vld [vmem:[%s1030_s1 + $0x8] sm:$0xff]  ;;  %v373_v17 = vld [vmem:[%s1031_s2 + $0x18] sm:$0xff] }
   0xf   : > { %v380_v2 = vld [vmem:[%s349_s15] sm:$0xff]  ;;  %v640_v10 = vld [vmem:[%s965_s21 + $0x18] sm:$0xff]  ;;  %393 = vperm.xlu2 %849, %v372_v14   ;;  %v371_v16 = vld [vmem:[%s1031_s2 + $0x8] sm:$0xff]  ;;  %s821_s26 = sshll.u32 %s1043_s29, 6 }
  0x10   : > { %402 = vst [vmem:[#allocation1] ss:$2 sm:$0xff] %v380_v2  ;;  %v637_v6 = vld [vmem:[%s965_s21] sm:$0xff]  ;;  %v368_v18 = vld [vmem:[%s1030_s1 + $0x10] sm:$0xff]  ;;  %v638_v20 = vld [vmem:[%s965_s21 + $0x8] sm:$0xff]  ;;  %s364_s10 = scalar_lea.vmem %s1037_s8, %s821_s26 }
  0x11   : > { %v370_v13 = vld [vmem:[%s1031_s2] sm:$0xff]  ;;  %v639_v23 = vld [vmem:[%s965_s21 + $0x10] sm:$0xff]  ;;  %v369_v24 = vld [vmem:[%s1030_s1 + $0x18] sm:$0xff] }
  0x12   : > { %383 = vperm.xlu1 %848, %v370_v13   ;;  %v378_v36 = vld [vmem:[%s1034_s5] sm:$0x1] }
  0x16   : > { %483 = vperm.xlu0 %847, %v376_v3  }
  0x17   : > { %v403_v4 = vld.sshfl [vmem:[#allocation1] sm:$0xff pattern:$0x75316420]  ;;  %v404_v5 = vld.sshfl [vmem:[#allocation1 + $0x8] sm:$0xff pattern:$0x75316420]  ;;  %398 = vperm.xlu2 %849, %v373_v17  }
  0x18   : > { %491 = vst [vmem:[#allocation1] ss:$2 sm:$0xff] %v380_v2  ;;  %797 = vmatpush.msk.msra.mxu0 %vm418_vm0, %v403_v4  ;;  %802 = vmatpush.msk.msra.mxu1 %vm418_vm0, %v404_v5 }
  0x19   : > { %798 = vmatmul.msk.f32.vlgmr.msra.gmra.mxu0 %vm405_vm1, %v366_v12  ;;  %803 = vmatmul.msk.f32.vlgmr.msra.gmra.mxu1 %vm405_vm1, %v366_v12 }
  0x1a   : > { %388 = vperm.xlu1 %848, %v371_v16  }
  0x1e   : > { %645 = vperm.xlu0 %847, %v637_v6  }
  0x1f   : > { %v492_v8 = vld.sshfl [vmem:[#allocation1] sm:$0xff pattern:$0x75316420]  ;;  %v493_v9 = vld.sshfl [vmem:[#allocation1 + $0x8] sm:$0xff pattern:$0x75316420]  ;;  %655 = vperm.xlu2 %849, %v639_v23  }
  0x20   : > { %807 = vmatpush.msk.msra.mxu2 %vm418_vm0, %v492_v8  ;;  %810 = vmatpush.msk.msra.mxu3 %vm418_vm0, %v493_v9 }
  0x21   : > { %808 = vmatmul.msk.f32.vlgmr.msra.gmra.mxu2 %vm405_vm1, %v374_v7  ;;  %811 = vmatmul.msk.f32.vlgmr.msra.gmra.mxu3 %vm405_vm1, %v374_v7 }
  0x22   : > { %799 = vmatmul.msk.f32.gmra.mxu0 %vm405_vm1, %v367_v15  ;;  %804 = vmatmul.msk.f32.gmra.mxu1 %vm405_vm1, %v367_v15 }
  0x23   : > { %650 = vperm.xlu1 %848, %v638_v20  }
  0x26   : > { %660 = vperm.xlu0 %847, %v640_v10  }
  0x29   : > { %809 = vmatmul.msk.f32.gmra.mxu2 %vm405_vm1, %v375_v11  ;;  %812 = vmatmul.msk.f32.gmra.mxu3 %vm405_vm1, %v375_v11 }
  0x2a   : > { %800 = vmatmul.msk.f32.gmra.mxu0 %vm405_vm1, %v368_v18  ;;  %805 = vmatmul.msk.f32.gmra.mxu1 %vm405_vm1, %v368_v18 }
  0x32   : > { %801 = vmatmul.msk.f32.gmra.mxu0 %vm405_vm1, %v369_v24  ;;  %806 = vmatmul.msk.f32.gmra.mxu1 %vm405_vm1, %v369_v24 }
  0x69   : > { %v394_v49 = vpop.permute.xlu2 %393 }
  0x71   : > { %v399_v58 = vpop.permute.xlu2 %398 }
  0x80   : > { %v489_v19 = vpop.permute.xlu0 %488 }
  0x84   : > { %v384_v50 = vpop.permute.xlu1 %383 }
  0x88   : > { %v484_v25 = vpop.permute.xlu0 %483 }
  0x8c   : > { %v389_v59 = vpop.permute.xlu1 %388 }
  0x90   : > { %v646_v61 = vpop.permute.xlu0 %645 }
  0x95   : > { %v651_v20 = vpop.permute.xlu1 %650 }
  0x96   : > { %v440_v44 = vpop.f32.mrf.mxu0  ;;  %v469_v45 = vpop.f32.mrf.mxu1 }
  0x97   : > { %v441_v16 = vadd.f32 %v440_v44, %v384_v50  ;;  %v470_v17 = vadd.f32 %v469_v45, %v384_v50 }
  0x9f   : > { %v443_v52 = vpop.f32.mrf.mxu0  ;;  %v472_v53 = vpop.f32.mrf.mxu1 }
  0xa4   : > { %v521_v21 = vpop.f32.mrf.mxu2  ;;  %v544_v22 = vpop.f32.mrf.mxu3 }
  0xa5   : > { %v522_v28 = vadd.f32 %v521_v21, %v484_v25  ;;  %v545_v29 = vadd.f32 %v544_v22, %v484_v25  ;;  %v661_v25 = vpop.permute.xlu0 %660 }
  0xa7   : > { %v550_v34 = vmax.f32 %v522_v28, 0.0  ;;  %v551_v35 = vmax.f32 %v545_v29, 0.0  ;;  %v446_v0 = vpop.f32.mrf.mxu0  ;;  %v475_v4 = vpop.f32.mrf.mxu1 }
  0xa8   : > { %v447_v22 = vadd.f32 %v446_v0, %v394_v49 }
  0xac   : > { %v524_v26 = vpop.f32.mrf.mxu2  ;;  %v547_v27 = vpop.f32.mrf.mxu3 }
  0xad   : > { %v525_v30 = vadd.f32 %v524_v26, %v489_v19  ;;  %v548_v31 = vadd.f32 %v547_v27, %v489_v19  ;;  %v656_v19 = vpop.permute.xlu2 %655  ;;  %v476_v27 = vadd.f32 %v475_v4, %v394_v49 }
  0xaf   : > { %v552_v32 = vmax.f32 %v525_v30, 0.0  ;;  %v553_v33 = vmax.f32 %v548_v31, 0.0  ;;  %v449_v30 = vpop.f32.mrf.mxu0 }
  0xb1   : > { %573 = vmatpush.msrb.mxu2 %v552_v32  ;;  %593 = vmatpush.msrb.mxu3 %v553_v33  ;;  %v444_v32 = vadd.f32 %v443_v52, %v389_v59 }
  0xb3   : > { %574 = vmatpush.msrb.mxu2 %v550_v34  ;;  %594 = vmatpush.msrb.mxu3 %v551_v35  ;;  %v478_v35 = vpop.f32.mrf.mxu1 }
  0xb4   : > { %813 = vmatmul.msk.f32.vlgmr.msrb.gmra.mxu2 %vm555_vm2, %v378_v36  ;;  %814 = vmatmul.msk.f32.vlgmr.msrb.gmra.mxu3 %vm555_vm2, %v378_v36 }
 0x137   : > { %v576_v38 = vpop.f32.mrf.mxu2  ;;  %v596_v39 = vpop.f32.mrf.mxu3 }
 0x138   : > { %v577_v40 = vadd.f32 %v576_v38, %v554_v37  ;;  %v597_v41 = vadd.f32 %v596_v39, %v554_v37  ;;  %v473_v37 = vadd.f32 %v472_v53, %v389_v59 }
 0x13a   : > { %v815_v42 = vmul.f32 -1.442695, %v577_v40  ;;  %v816_v43 = vmul.f32 -1.442695, %v597_v41  ;;  %v450_v41 = vadd.f32 %v449_v30, %v399_v58 }
 0x13c   : > { %850 = vpow2.f32 %v815_v42 }
 0x13d   : > { %852 = vpow2.f32 %v816_v43  ;;  %v479_v43 = vadd.f32 %v478_v35, %v399_v58 }
 0x142   : > { %v851_v46 = vpop.eup %850 }
 0x143   : > { %v853_v47 = vpop.eup %852  ;;  %v605_v48 = vadd.f32 1.0, %v851_v46 }
 0x144   : > { %v606_v51 = vadd.f32 1.0, %v853_v47 }
 0x145   : > { %854 = vrcp.f32 %v605_v48  ;;  %v618_v62 = vand.u32 2147483648, %v605_v48  ;;  %v616_v2 = vand.u32 2147483647, %v605_v48  ;;  %vm612_vm5 = vweird.f32 %v605_v48 }
 0x146   : > { %856 = vrcp.f32 %v606_v51  ;;  %v633_v3 = vand.u32 2147483648, %v606_v51  ;;  %v631_v6 = vand.u32 2147483647, %v606_v51  ;;  %vm627_vm7 = vweird.f32 %v606_v51 }
 0x147   : > { %v619_v8 = vor.u32 1.1754944e-38, %v618_v62  ;;  %vm617_vm9 = vcmp.eq.f32.partialorder %v616_v2, 8.507059e+37 }
 0x148   : > { %v634_v10 = vor.u32 1.1754944e-38, %v633_v3  ;;  %vm632_vm10 = vcmp.eq.f32.partialorder %v631_v6, 8.507059e+37 }
 0x14b   : > { %v855_v54 = vpop.eup %854 }
 0x14c   : > { %v857_v55 = vpop.eup %856  ;;  %v608_v56 = vmul.f32 %v855_v54, %v605_v48  ;;  %vm613_vm3 = vweird.f32 %v855_v54 }
 0x14d   : > { %v623_v57 = vmul.f32 %v857_v55, %v606_v51  ;;  %vm628_vm4 = vweird.f32 %v857_v55  ;;  %vm614_vm6 = vmor %vm612_vm5, %vm613_vm3 }
 0x14e   : > { %v609_v60 = vsub.f32 1.0, %v608_v56  ;;  %vm629_vm8 = vmor %vm627_vm7, %vm628_vm4 }
 0x14f   : > { %v624_v63 = vsub.f32 1.0, %v623_v57 }
 0x150   : > { %v610_v1 = vmul.f32 %v855_v54, %v609_v60 }
 0x151   : > { %v625_v5 = vmul.f32 %v857_v55, %v624_v63 }
 0x152   : > { %v611_v7 = vadd.f32 %v855_v54, %v610_v1 }
 0x153   : > { %v626_v9 = vadd.f32 %v857_v55, %v625_v5 }
 0x154   : > { %v615_v11 = vsel %vm614_vm6, %v855_v54, %v611_v7 }
 0x155   : > { %v620_v12 = vsel %vm617_vm9, %v619_v8, %v615_v11  ;;  %v630_v13 = vsel %vm629_vm8, %v857_v55, %v626_v9 }
 0x156   : > { %v635_v14 = vsel %vm632_vm10, %v634_v10, %v630_v13  ;;  %v641_v15 = vperm.slane %v620_v12, 0 }
 0x157   : > { %v642_v18 = vperm.slane %v635_v14, 0 }
 0x158   : > { %v663_v21 = vadd.f32 %v646_v61, %v641_v15  ;;  %v667_v23 = vadd.f32 %v656_v19, %v641_v15  ;;  %v665_v24 = vadd.f32 %v651_v20, %v641_v15  ;;  %v669_v34 = vadd.f32 %v661_v25, %v641_v15 }
 0x159   : > { %v664_v26 = vadd.f32 %v646_v61, %v642_v18  ;;  %v668_v28 = vadd.f32 %v656_v19, %v642_v18  ;;  %v666_v29 = vadd.f32 %v651_v20, %v642_v18  ;;  %v670_v39 = vadd.f32 %v661_v25, %v642_v18 }
 0x15a   : > { %v671_v31 = vmul.f32 %v663_v21, %v441_v16  ;;  %v675_v33 = vmul.f32 %v667_v23, %v447_v22  ;;  %v673_v40 = vmul.f32 %v665_v24, %v444_v32  ;;  %v677_v44 = vmul.f32 %v669_v34, %v450_v41 }
 0x15b   : > { %v672_v36 = vmul.f32 %v664_v26, %v470_v17  ;;  %v676_v38 = vmul.f32 %v668_v28, %v476_v27  ;;  %v674_v42 = vmul.f32 %v666_v29, %v473_v37  ;;  %v678_v45 = vmul.f32 %v670_v39, %v479_v43 }
 0x15c   : > { %679 = vst [vmem:[%s364_s10] sm:$0xff] %v671_v31 }
 0x15d   : > { %680 = vst [vmem:[%s364_s10 + $0x8] sm:$0xff] %v672_v36 }
 0x15e   : > { %683 = vst [vmem:[%s364_s10 + $0x20] sm:$0xff] %v675_v33 }
 0x15f   : > { %684 = vst [vmem:[%s364_s10 + $0x28] sm:$0xff] %v676_v38 }
 0x160   : > { %681 = vst [vmem:[%s364_s10 + $0x10] sm:$0xff] %v673_v40 }
 0x161   : > { %682 = vst [vmem:[%s364_s10 + $0x18] sm:$0xff] %v674_v42 }
 0x162   : > { %685 = vst [vmem:[%s364_s10 + $0x30] sm:$0xff] %v677_v44 }
 0x163   : > { %686 = vst [vmem:[%s364_s10 + $0x38] sm:$0xff] %v678_v45 }
 0x164 PF: > { %s19_s9 = sadd.s32 1, %s880_s9   ;;  %s1038_s29 = smov %s876_s30 }
 0x165   : > { %p16_p5 = scmp.ge.s32.totalorder %s19_s9, 4   ;;  %s1039_s30 = smov %s1041_s6 }
 0x167   :  { %18 = sbr.rel (!%p16_p5) target bundleno = 2 (0x2), region = 85 }

</bundles_post_ra>
